<compile_context>
chip_gen: v5e
topology: v5e:2x2
jax: 0.10.0
libtpu: 0.0.40
codegen_flags: <defaults>
</compile_context>

<pallas_src>
import jax
import jax.numpy as jnp
from jax.experimental import pallas as pl
from jax.experimental.pallas import tpu as pltpu


def _round_up(x, m):
    return ((x + m - 1) // m) * m


# ----------------------------------------------------------------------------
# Fused Pallas kernel: whole LFR forward in one invocation
# ----------------------------------------------------------------------------
def _lfr_fused_kernel(x_ref, we_ref, be_ref, w1_ref, b1_ref, w2_ref, b2_ref,
                      z_out_ref, p_out_ref):
    # x arrives as f32; cast to bf16 on the VPU here (free slot) instead of a
    # separate wrapper-side XLA pass over x in HBM.
    x_bf16 = x_ref[...].astype(jnp.bfloat16)

    # (1) online encoder + all T target encoders in ONE matmul:
    #     z_all = relu(x @ [W_enc | W_tgt_0 | ... | W_tgt_{T-1}] + b_all)
    #     x: [B_pad, K] bf16, we: [K, (1+T)*dim] bf16 -> z_all: [B_pad, (1+T)*dim] f32
    z_all = jnp.dot(x_bf16, we_ref[...], preferred_element_type=jnp.float32)
    z_all = jnp.maximum(z_all + be_ref[...], 0.0)
    z_out_ref[...] = z_all                      # lane-dense, unmasked store

    # (2) all T predictors fused, with NO in-kernel slicing:
    #     layer 1: w1 is K-padded to the full (1+T)*dim rows (only the online
    #              encoder's `dim` rows are nonzero) and its hidden width is
    #              zero-padded to 128 lanes -> unmasked h, MXU-aligned K.
    #     layer 2: block-diagonal weights, output width padded to 128 lanes
    #              -> p_all[:, i*dim:(i+1)*dim] == predictor_i(z_w) exactly.
    h = jnp.dot(z_all.astype(jnp.bfloat16), w1_ref[...],
                preferred_element_type=jnp.float32)
    h = jnp.maximum(h + b1_ref[...], 0.0).astype(jnp.bfloat16)
    p = jnp.dot(h, w2_ref[...], preferred_element_type=jnp.float32)
    p_out_ref[...] = p + b2_ref[...]            # lane-dense, unmasked store


def lfr_fused_call(x_flat, fused):
    B, K = x_flat.shape
    n_enc = fused["w_enc"].shape[1]             # (1+T)*dim
    n_hid = fused["w1"].shape[1]                # T*pred_dim padded to 128
    n_out = fused["w2"].shape[1]                # T*dim padded to 128

    flops = 2 * B * (K * n_enc + n_enc * n_hid + n_hid * n_out)
    bytes_accessed = (
        x_flat.size * x_flat.dtype.itemsize
        + sum(int(v.size) * v.dtype.itemsize for v in fused.values())
        + B * (n_enc + n_out) * 4
    )

    vmem_spec = lambda: pl.BlockSpec(memory_space=pltpu.MemorySpace.VMEM)
    z_all, p_all = pl.pallas_call(
        _lfr_fused_kernel,
        out_shape=(
            jax.ShapeDtypeStruct((B, n_enc), jnp.float32),
            jax.ShapeDtypeStruct((B, n_out), jnp.float32),
        ),
        in_specs=[vmem_spec() for _ in range(7)],
        out_specs=(vmem_spec(), vmem_spec()),
        cost_estimate=pl.CostEstimate(
            flops=int(flops), transcendentals=0,
            bytes_accessed=int(bytes_accessed)),
    )(x_flat, fused["w_enc"], fused["b_enc"], fused["w1"], fused["b1"],
      fused["w2"], fused["b2"])
    return z_all, p_all


# ----------------------------------------------------------------------------
# LFR model (parameters + packing + forward)
# ----------------------------------------------------------------------------
def init_lfr_params(key, in_features, dim, pred_dim, num_targets):
    keys = jax.random.split(key, 2 + 6 * num_targets)
    kidx = 0

    def nxt():
        nonlocal kidx
        k = keys[kidx]
        kidx += 1
        return k

    scale_in = 1.0 / jnp.sqrt(in_features)
    scale_d = 1.0 / jnp.sqrt(dim)
    scale_p = 1.0 / jnp.sqrt(pred_dim)

    params = {
        "enc_w": jax.random.normal(nxt(), (in_features, dim), jnp.float32) * scale_in,
        "enc_b": jax.random.normal(nxt(), (dim,), jnp.float32) * 0.01,
        "targets": [],
        "predictors": [],
    }
    for _ in range(num_targets):
        params["targets"].append({
            "w": jax.random.normal(nxt(), (in_features, dim), jnp.float32) * scale_in,
            "b": jax.random.normal(nxt(), (dim,), jnp.float32) * 0.01,
        })
        params["predictors"].append({
            "w1": jax.random.normal(nxt(), (dim, pred_dim), jnp.float32) * scale_d,
            "b1": jax.random.normal(nxt(), (pred_dim,), jnp.float32) * 0.01,
            "w2": jax.random.normal(nxt(), (pred_dim, dim), jnp.float32) * scale_p,
            "b2": jax.random.normal(nxt(), (dim,), jnp.float32) * 0.01,
        })
    return params


def fuse_lfr_params(params, dim, pred_dim, num_targets):
    """Pack per-module parameters into the fused kernel layout (bf16 weights).

    All padding happens here, once, at pack time:
      * w1 K-padded to (1+T)*dim rows so the kernel can feed z_all directly,
      * predictor hidden width padded to 128 lanes,
      * predictor output width padded to 128 lanes.
    """
    n_enc = (1 + num_targets) * dim
    n_hid = max(128, _round_up(num_targets * pred_dim, 128))
    n_out = max(128, _round_up(num_targets * dim, 128))

    # Encoders: online + T targets, lane-concatenated along N.
    w_enc = jnp.concatenate(
        [params["enc_w"]] + [t["w"] for t in params["targets"]], axis=1)
    b_enc = jnp.concatenate(
        [params["enc_b"]] + [t["b"] for t in params["targets"]], axis=0)

    # Predictor layer 1: K padded to n_enc (only the first `dim` rows — the
    # online-encoder slice of z_all — are nonzero), hidden padded to n_hid.
    w1 = jnp.zeros((n_enc, n_hid), jnp.float32)
    b1 = jnp.zeros((n_hid,), jnp.float32)
    # Predictor layer 2: block-diagonal, K = n_hid, output padded to n_out.
    # TODO(synk): O(T^2) layout; replace with a grid-over-T / batched
    # [T, pred_dim, dim] formulation before scaling (see header TODO).
    w2 = jnp.zeros((n_hid, n_out), jnp.float32)
    b2 = jnp.zeros((n_out,), jnp.float32)
    for i, p in enumerate(params["predictors"]):
        w1 = w1.at[:dim, i * pred_dim:(i + 1) * pred_dim].set(p["w1"])
        b1 = b1.at[i * pred_dim:(i + 1) * pred_dim].set(p["b1"])
        w2 = w2.at[i * pred_dim:(i + 1) * pred_dim,
                   i * dim:(i + 1) * dim].set(p["w2"])
        b2 = b2.at[i * dim:(i + 1) * dim].set(p["b2"])

    return {
        "w_enc": w_enc.astype(jnp.bfloat16),
        "b_enc": b_enc.reshape(1, -1).astype(jnp.float32),
        "w1": w1.astype(jnp.bfloat16),
        "b1": b1.reshape(1, -1).astype(jnp.float32),
        "w2": w2.astype(jnp.bfloat16),
        "b2": b2.reshape(1, -1).astype(jnp.float32),
    }


def lfr_forward(fused, x, num_targets, dim):
    """Matches LFR.forward: returns (predicted_reps, target_reps) lists."""
    B = x.shape[0]
    # Keep x in f32; the bf16 cast happens inside the kernel on the VPU.
    x_flat = x.reshape(B, -1).astype(jnp.float32)
    # Pad the batch to a sublane-aligned M (>= 8) so output stores are
    # unmasked; padded rows are zeros and get sliced away below.
    # (Real workloads: feed M >= 128 / 256 for actual MXU row utilization.)
    B_pad = max(8, _round_up(B, 8))
    if B_pad != B:
        x_flat = jnp.pad(x_flat, ((0, B_pad - B), (0, 0)))

    z_all, p_all = lfr_fused_call(x_flat, fused)
    # z_all = [z_w | z_a_0 | ... | z_a_{T-1}], p_all = [p_0 | ... | p_{T-1} | pad]
    target_reps = [z_all[:B, (1 + i) * dim:(2 + i) * dim] for i in range(num_targets)]
    predicted_reps = [p_all[:B, i * dim:(i + 1) * dim] for i in range(num_targets)]
    return predicted_reps, target_reps


# ----------------------------------------------------------------------------
# Main
# ----------------------------------------------------------------------------
if __name__ == "__main__":
    B, C, H, W = 2, 4, 16, 16          # input images, NCHW
    dim, pred_dim, num_targets = 32, 16, 3

    key = jax.random.PRNGKey(0)
    k_x, k_p = jax.random.split(key)
    x = jax.random.normal(k_x, (B, C, H, W), jnp.float32)
    params = init_lfr_params(k_p, C * H * W, dim, pred_dim, num_targets)
    fused = fuse_lfr_params(params, dim, pred_dim, num_targets)

    predicted_reps, target_reps = lfr_forward(fused, x, num_targets, dim)
    jax.block_until_ready(predicted_reps)
    jax.block_until_ready(target_reps)

    # Reference check against plain JAX using the same bf16-rounded operands
    # (MXU does bf16 x bf16 with f32 accumulation == f32 matmul of bf16 values).
    # NOTE: at these toy sizes the kernel is pure launch/DMA overhead; any
    # benchmarking should use xprof min-of-N on the jit, not perf_counter.
    def bf(a):
        return a.astype(jnp.bfloat16).astype(jnp.float32)

    hi = jax.lax.Precision.HIGHEST
    x_flat32 = bf(x.reshape(B, -1))
    z_w_ref = jnp.maximum(
        jnp.dot(x_flat32, bf(params["enc_w"]), precision=hi) + params["enc_b"], 0.0)

    ok = True
    for i in range(num_targets):
        tgt = params["targets"][i]
        prd = params["predictors"][i]
        z_a_ref = jnp.maximum(
            jnp.dot(x_flat32, bf(tgt["w"]), precision=hi) + tgt["b"], 0.0)
        h_ref = jnp.maximum(
            jnp.dot(bf(z_w_ref), bf(prd["w1"]), precision=hi) + prd["b1"], 0.0)
        p_a_ref = jnp.dot(bf(h_ref), bf(prd["w2"]), precision=hi) + prd["b2"]
        ok &= bool(jnp.allclose(target_reps[i], z_a_ref, atol=1e-3, rtol=1e-3))
        ok &= bool(jnp.allclose(predicted_reps[i], p_a_ref, atol=1e-2, rtol=1e-2))

    assert ok, "Pallas LFR forward mismatch vs JAX reference"
    assert all(p.shape == (B, dim) for p in predicted_reps)
    assert all(t.shape == (B, dim) for t in target_reps)
    print("KERNEL_OK")
</pallas_src>

<mosaic_0001>
module attributes {stable_mosaic.version = 11 : i64} {
  func.func @_lfr_fused_kernel(%arg0: memref<8x1024xf32, #tpu.memory_space<vmem>>, %arg1: memref<1024x128xbf16, #tpu.memory_space<vmem>>, %arg2: memref<1x128xf32, #tpu.memory_space<vmem>>, %arg3: memref<128x128xbf16, #tpu.memory_space<vmem>>, %arg4: memref<1x128xf32, #tpu.memory_space<vmem>>, %arg5: memref<128x128xbf16, #tpu.memory_space<vmem>>, %arg6: memref<1x128xf32, #tpu.memory_space<vmem>>, %arg7: memref<8x128xf32, #tpu.memory_space<vmem>>, %arg8: memref<8x128xf32, #tpu.memory_space<vmem>>) attributes {dimension_semantics = [], scalar_prefetch = 0 : i64, scratch_operands = 0 : i64, tpu.core_type = #tpu.core_type<tc>} {
    %c0 = arith.constant 0 : index
    %c0_0 = arith.constant 0 : index
    %0 = vector.load %arg0[%c0, %c0_0] : memref<8x1024xf32, #tpu.memory_space<vmem>>, vector<8x1024xf32>
    %1 = arith.truncf %0 : vector<8x1024xf32> to vector<8x1024xbf16>
    %c0_1 = arith.constant 0 : index
    %c0_2 = arith.constant 0 : index
    %2 = vector.load %arg1[%c0_1, %c0_2] : memref<1024x128xbf16, #tpu.memory_space<vmem>>, vector<1024x128xbf16>
    %cst = arith.constant dense<0.000000e+00> : vector<8x128xf32>
    %3 = tpu.matmul %1, %2, %cst {dimension_numbers = #tpu.dot_dimension_numbers<[1], [0], [0], [1], [0, 0, 1, 1], [], []>} : vector<8x1024xbf16>, vector<1024x128xbf16>, vector<8x128xf32> -> vector<8x128xf32>
    %c0_3 = arith.constant 0 : index
    %c0_4 = arith.constant 0 : index
    %4 = vector.load %arg2[%c0_3, %c0_4] : memref<1x128xf32, #tpu.memory_space<vmem>>, vector<1x128xf32>
    %5 = vector.broadcast %4 : vector<1x128xf32> to vector<8x128xf32>
    %6 = arith.addf %3, %5 : vector<8x128xf32>
    %cst_5 = arith.constant 0.000000e+00 : f32
    %7 = vector.broadcast %cst_5 : f32 to vector<8x128xf32>
    %8 = arith.maximumf %6, %7 : vector<8x128xf32>
    %c0_6 = arith.constant 0 : index
    %c0_7 = arith.constant 0 : index
    %9 = vector.load %arg7[%c0_6, %c0_7] : memref<8x128xf32, #tpu.memory_space<vmem>>, vector<8x128xf32>
    tpu.vector_store %arg7[%c0_6, %c0_7], %8 {strides = array<i32>} : memref<8x128xf32, #tpu.memory_space<vmem>>, vector<8x128xf32>,
    %10 = arith.truncf %8 : vector<8x128xf32> to vector<8x128xbf16>
    %c0_8 = arith.constant 0 : index
    %c0_9 = arith.constant 0 : index
    %11 = vector.load %arg3[%c0_8, %c0_9] : memref<128x128xbf16, #tpu.memory_space<vmem>>, vector<128x128xbf16>
    %cst_10 = arith.constant dense<0.000000e+00> : vector<8x128xf32>
    %12 = tpu.matmul %10, %11, %cst_10 {dimension_numbers = #tpu.dot_dimension_numbers<[1], [0], [0], [1], [0, 0, 1, 1], [], []>} : vector<8x128xbf16>, vector<128x128xbf16>, vector<8x128xf32> -> vector<8x128xf32>
    %c0_11 = arith.constant 0 : index
    %c0_12 = arith.constant 0 : index
    %13 = vector.load %arg4[%c0_11, %c0_12] : memref<1x128xf32, #tpu.memory_space<vmem>>, vector<1x128xf32>
    %14 = vector.broadcast %13 : vector<1x128xf32> to vector<8x128xf32>
    %15 = arith.addf %12, %14 : vector<8x128xf32>
    %cst_13 = arith.constant 0.000000e+00 : f32
    %16 = vector.broadcast %cst_13 : f32 to vector<8x128xf32>
    %17 = arith.maximumf %15, %16 : vector<8x128xf32>
    %18 = arith.truncf %17 : vector<8x128xf32> to vector<8x128xbf16>
    %c0_14 = arith.constant 0 : index
    %c0_15 = arith.constant 0 : index
    %19 = vector.load %arg5[%c0_14, %c0_15] : memref<128x128xbf16, #tpu.memory_space<vmem>>, vector<128x128xbf16>
    %cst_16 = arith.constant dense<0.000000e+00> : vector<8x128xf32>
    %20 = tpu.matmul %18, %19, %cst_16 {dimension_numbers = #tpu.dot_dimension_numbers<[1], [0], [0], [1], [0, 0, 1, 1], [], []>} : vector<8x128xbf16>, vector<128x128xbf16>, vector<8x128xf32> -> vector<8x128xf32>
    %c0_17 = arith.constant 0 : index
    %c0_18 = arith.constant 0 : index
    %21 = vector.load %arg6[%c0_17, %c0_18] : memref<1x128xf32, #tpu.memory_space<vmem>>, vector<1x128xf32>
    %22 = vector.broadcast %21 : vector<1x128xf32> to vector<8x128xf32>
    %23 = arith.addf %20, %22 : vector<8x128xf32>
    %c0_19 = arith.constant 0 : index
    %c0_20 = arith.constant 0 : index
    %24 = vector.load %arg8[%c0_19, %c0_20] : memref<8x128xf32, #tpu.memory_space<vmem>>, vector<8x128xf32>
    tpu.vector_store %arg8[%c0_19, %c0_20], %23 {strides = array<i32>} : memref<8x128xf32, #tpu.memory_space<vmem>>, vector<8x128xf32>,
    return
  }
}

</mosaic_0001>

<bundles_post_ra>
// kernel: tpu_custom_call.1
= control target key start
LH: loop header
LB: loop body
LE: loop exit
PB: predicated region body
PF: predicated region fallthrough
CT: control target
= control target key end

     0   :  { %14 = vsyncpa [#allocation3], 0  ;;  %s1575_s0 = inlined_call_operand.hbm [shape: f32[8,1024], index: 0, kind: input, shape index: {}]   ;;  %s1576_s1 = inlined_call_operand.hbm [shape: bf16[1024,128], index: 1, kind: input, shape index: {}]   ;;  %s1577_s2 = inlined_call_operand.vmem [shape: f32[1,128], index: 2, kind: input, shape index: {}]   ;;  %s1578_s3 = inlined_call_operand.hbm [shape: bf16[128,128], index: 3, kind: input, shape index: {}]   ;;  %s1579_s4 = inlined_call_operand.vmem [shape: f32[1,128], index: 4, kind: input, shape index: {}]   ;;  %s1580_s5 = inlined_call_operand.hbm [shape: bf16[128,128], index: 5, kind: input, shape index: {}]   ;;  %s1581_s6 = inlined_call_operand.vmem [shape: f32[1,128], index: 6, kind: input, shape index: {}]   ;;  %s1582_s7 = inlined_call_operand.hbm [shape: f32[8,128], index: 7, kind: output, shape index: {0}]   ;;  %s1583_s8 = inlined_call_operand.hbm [shape: f32[8,128], index: 8, kind: output, shape index: {1}]  }
   0x1   :  { %15 = vsyncpa [#allocation6], 0 }
   0x2   :  { %16 = vsyncpa [#allocation9], 0 }
   0x3   :  { %17 = vsyncpa [#allocation4], 0  ;;  %s34_s29 = sshll.u32 %s1576_s1, 4  ;;  %s35_s29 = int_to_ptr.hbm [resolvable:$true] %s34_s29 }
   0x4   :  { %18 = vsyncpa [#allocation12], 0  ;;  %s1495_s30 = smov [#allocation5]   ;;  %s24_s12 = sshll.u32 %s1575_s0, 4  ;;  %s25_s12 = int_to_ptr.hbm [resolvable:$true] %s24_s12 }
   0x5   :  { %s36_s9 = sshll.u32 %s1495_s30, 4  ;;  %s1496_s13 = smov 64   ;;  %s37_s9 = int_to_ptr.vmem [resolvable:$true] %s36_s9 }
   0x6   :  { %s1497_s14 = smov 4   ;;  %s1498_s15 = smov [#allocation2]  }
   0x7   :  { %42 = dma.hbm_to_vmem [thread:$0]  %s35_s29, 8192, %s37_s9, [#allocation6], %s1496_s13, %s1496_s13, %s1497_s14  }
   0x8   :  { %s26_s16 = sshll.u32 %s1498_s15, 4  ;;  %s49_s19 = sshll.u32 %s1578_s3, 4  ;;  %s27_s16 = int_to_ptr.vmem [resolvable:$true] %s26_s16  ;;  %s50_s19 = int_to_ptr.hbm [resolvable:$true] %s49_s19 }
   0x9   :  { %29 = dma.hbm_to_vmem [thread:$0]  %s25_s12, 1024, %s27_s16, [#allocation3]  }
   0xa   :  { %s64_s21 = sshll.u32 %s1580_s5, 4  ;;  %s1499_s22 = smov [#allocation7]   ;;  %s65_s21 = int_to_ptr.hbm [resolvable:$true] %s64_s21 }
   0xb   :  { %s51_s23 = sshll.u32 %s1499_s22, 4  ;;  %s1500_s0 = smov [#allocation8]   ;;  %s52_s23 = int_to_ptr.vmem [resolvable:$true] %s51_s23 }
   0xc   :  { %57 = dma.hbm_to_vmem [thread:$0]  %s50_s19, 1024, %s52_s23, [#allocation6], %s1496_s13, %s1496_s13, %s1497_s14  }
   0xd   :  { %s66_s24 = sshll.u32 %s1500_s0, 4  ;;  %s67_s24 = int_to_ptr.vmem [resolvable:$true] %s66_s24 }
   0xe   :  { %72 = dma.hbm_to_vmem [thread:$0]  %s65_s21, 1024, %s67_s24, [#allocation9], %s1496_s13, %s1496_s13, %s1497_s14  }
   0xf   :  { %1485 = dma.done.wait [#allocation3], 1024  }
  0x10   :  { %1486 = vsyncadd [#allocation3], 4294966272 }
  0x11   :  { %1487 = dma.done.wait [#allocation6], 9216  }
  0x12   :  { %1488 = vsyncadd [#allocation6], 4294958080 }
  0x13   :  { %1489 = dma.done.wait [#allocation9], 1024  }
  0x14   :  { %1490 = vsyncadd [#allocation9], 4294966272  ;;  %v1257_v0 = vld [vmem:[#allocation5 + $0x38] sm:$0xff]  ;;  %v1256_v4 = vld [vmem:[#allocation5 + $0x30] sm:$0xff]  ;;  %s1501_s26 = smov [#allocation10]   ;;  %s902_s30 = sshll.u32 %s1582_s7, 4  ;;  %s903_s30 = int_to_ptr.hbm [resolvable:$true] %s902_s30 }
  0x15   :  { %v1265_v1 = vld [vmem:[#allocation5 + $0x78] sm:$0xff]  ;;  %623 = vmatpush.bf16.msra.mxu0 %v1257_v0  ;;  %v1264_v5 = vld [vmem:[#allocation5 + $0x70] sm:$0xff]  ;;  %v1255_v8 = vld [vmem:[#allocation5 + $0x28] sm:$0xff]  ;;  %s900_s27 = sshll.u32 %s1501_s26, 4  ;;  %s913_s14 = sshll.u32 %s1583_s8, 4  ;;  %s901_s27 = int_to_ptr.vmem [resolvable:$true] %s900_s27  ;;  %s914_s14 = int_to_ptr.hbm [resolvable:$true] %s913_s14 }
  0x16   :  { %v1273_v2 = vld [vmem:[#allocation5 + $0xb8] sm:$0xff]  ;;  %636 = vmatpush.bf16.msra.mxu1 %v1265_v1  ;;  %v1272_v6 = vld [vmem:[#allocation5 + $0xb0] sm:$0xff]  ;;  %v1263_v9 = vld [vmem:[#allocation5 + $0x68] sm:$0xff] }
  0x17   :  { %v1281_v3 = vld [vmem:[#allocation5 + $0xf8] sm:$0xff]  ;;  %649 = vmatpush.bf16.msra.mxu2 %v1273_v2  ;;  %v1280_v7 = vld [vmem:[#allocation5 + $0xf0] sm:$0xff]  ;;  %v1271_v10 = vld [vmem:[#allocation5 + $0xa8] sm:$0xff] }
  0x18   :  { %662 = vmatpush.bf16.msra.mxu3 %v1281_v3  ;;  %v1279_v11 = vld [vmem:[#allocation5 + $0xe8] sm:$0xff]  ;;  %v1254_v12 = vld [vmem:[#allocation5 + $0x20] sm:$0xff]  ;;  %v1253_v16 = vld [vmem:[#allocation5 + $0x18] sm:$0xff] }
  0x19   :  { %624 = vmatpush.bf16.msra.mxu0 %v1256_v4  ;;  %v1262_v13 = vld [vmem:[#allocation5 + $0x60] sm:$0xff]  ;;  %v1261_v17 = vld [vmem:[#allocation5 + $0x58] sm:$0xff]  ;;  %v1252_v20 = vld [vmem:[#allocation5 + $0x10] sm:$0xff] }
  0x1a   :  { %637 = vmatpush.bf16.msra.mxu1 %v1264_v5  ;;  %v1270_v14 = vld [vmem:[#allocation5 + $0xa0] sm:$0xff]  ;;  %v1269_v18 = vld [vmem:[#allocation5 + $0x98] sm:$0xff]  ;;  %v1260_v21 = vld [vmem:[#allocation5 + $0x50] sm:$0xff] }
  0x1b   :  { %650 = vmatpush.bf16.msra.mxu2 %v1272_v6  ;;  %v1278_v15 = vld [vmem:[#allocation5 + $0xe0] sm:$0xff]  ;;  %v1277_v19 = vld [vmem:[#allocation5 + $0xd8] sm:$0xff]  ;;  %v1268_v22 = vld [vmem:[#allocation5 + $0x90] sm:$0xff] }
  0x1c   :  { %663 = vmatpush.bf16.msra.mxu3 %v1280_v7  ;;  %v1276_v23 = vld [vmem:[#allocation5 + $0xd0] sm:$0xff]  ;;  %v1251_v24 = vld [vmem:[#allocation5 + $0x8] sm:$0xff]  ;;  %v1250_v28 = vld [vmem:[#allocation5] sm:$0xff] }
  0x1d   :  { %625 = vmatpush.bf16.msra.mxu0 %v1255_v8  ;;  %v1259_v25 = vld [vmem:[#allocation5 + $0x48] sm:$0xff]  ;;  %v1258_v29 = vld [vmem:[#allocation5 + $0x40] sm:$0xff]  ;;  %v1289_v32 = vld [vmem:[#allocation5 + $0x138] sm:$0xff] }
  0x1e   :  { %638 = vmatpush.bf16.msra.mxu1 %v1263_v9  ;;  %v1267_v26 = vld [vmem:[#allocation5 + $0x88] sm:$0xff]  ;;  %v1266_v30 = vld [vmem:[#allocation5 + $0x80] sm:$0xff]  ;;  %v93_v33 = vld [vmem:[#allocation2 + $0x10] sm:$0xff] }
  0x1f   :  { %651 = vmatpush.bf16.msra.mxu2 %v1271_v10  ;;  %v1275_v27 = vld [vmem:[#allocation5 + $0xc8] sm:$0xff]  ;;  %v1274_v31 = vld [vmem:[#allocation5 + $0xc0] sm:$0xff]  ;;  %v1297_v35 = vld [vmem:[#allocation5 + $0x178] sm:$0xff]  ;;  %v101_v40 = vpack.c.bf16 %v93_v33, %v93_v33 }
  0x20   :  { %664 = vmatpush.bf16.msra.mxu3 %v1279_v11  ;;  %v91_v34 = vld [vmem:[#allocation2] sm:$0xff]  ;;  %v94_v36 = vld [vmem:[#allocation2 + $0x18] sm:$0xff]  ;;  %v92_v37 = vld [vmem:[#allocation2 + $0x8] sm:$0xff] }
  0x21   :  { %626 = vmatpush.bf16.msra.mxu0 %v1254_v12  ;;  %v1305_v38 = vld [vmem:[#allocation5 + $0x1b8] sm:$0xff]  ;;  %v99_v41 = vpack.c.bf16 %v91_v34, %v91_v34  ;;  %v102_v42 = vpack.c.bf16 %v94_v36, %v94_v36  ;;  %v100_v43 = vpack.c.bf16 %v92_v37, %v92_v37  ;;  %v1288_v44 = vld [vmem:[#allocation5 + $0x130] sm:$0xff]  ;;  %v1287_v48 = vld [vmem:[#allocation5 + $0x128] sm:$0xff] }
  0x22   :  { %639 = vmatpush.bf16.msra.mxu1 %v1262_v13  ;;  %v1313_v39 = vld [vmem:[#allocation5 + $0x1f8] sm:$0xff]  ;;  %v1296_v45 = vld [vmem:[#allocation5 + $0x170] sm:$0xff]  ;;  %v1295_v49 = vld [vmem:[#allocation5 + $0x168] sm:$0xff] }
  0x23   :  { %652 = vmatpush.bf16.msra.mxu2 %v1270_v14  ;;  %v1304_v46 = vld [vmem:[#allocation5 + $0x1b0] sm:$0xff]  ;;  %v1303_v50 = vld [vmem:[#allocation5 + $0x1a8] sm:$0xff]  ;;  %v1286_v52 = vld [vmem:[#allocation5 + $0x120] sm:$0xff] }
  0x24   :  { %665 = vmatpush.bf16.msra.mxu3 %v1278_v15  ;;  %v1312_v47 = vld [vmem:[#allocation5 + $0x1f0] sm:$0xff]  ;;  %v1311_v51 = vld [vmem:[#allocation5 + $0x1e8] sm:$0xff]  ;;  %v1294_v53 = vld [vmem:[#allocation5 + $0x160] sm:$0xff] }
  0x25   :  { %627 = vmatpush.bf16.msra.mxu0 %v1253_v16  ;;  %v1302_v54 = vld [vmem:[#allocation5 + $0x1a0] sm:$0xff]  ;;  %v1285_v56 = vld [vmem:[#allocation5 + $0x118] sm:$0xff]  ;;  %v1284_v60 = vld [vmem:[#allocation5 + $0x110] sm:$0xff] }
  0x26   :  { %640 = vmatpush.bf16.msra.mxu1 %v1261_v17  ;;  %v1310_v55 = vld [vmem:[#allocation5 + $0x1e0] sm:$0xff]  ;;  %v1293_v57 = vld [vmem:[#allocation5 + $0x158] sm:$0xff]  ;;  %v1292_v61 = vld [vmem:[#allocation5 + $0x150] sm:$0xff] }
  0x27   :  { %653 = vmatpush.bf16.msra.mxu2 %v1269_v18  ;;  %v1301_v58 = vld [vmem:[#allocation5 + $0x198] sm:$0xff]  ;;  %v1300_v62 = vld [vmem:[#allocation5 + $0x190] sm:$0xff]  ;;  %v1283_v0 = vld [vmem:[#allocation5 + $0x108] sm:$0xff] }
  0x28   :  { %666 = vmatpush.bf16.msra.mxu3 %v1277_v19  ;;  %v1309_v59 = vld [vmem:[#allocation5 + $0x1d8] sm:$0xff]  ;;  %v1308_v63 = vld [vmem:[#allocation5 + $0x1d0] sm:$0xff]  ;;  %v1291_v1 = vld [vmem:[#allocation5 + $0x148] sm:$0xff] }
  0x29   :  { %628 = vmatpush.bf16.msra.mxu0 %v1252_v20  ;;  %v1299_v2 = vld [vmem:[#allocation5 + $0x188] sm:$0xff]  ;;  %v1282_v4 = vld [vmem:[#allocation5 + $0x100] sm:$0xff]  ;;  %v97_v10 = vld [vmem:[#allocation2 + $0x30] sm:$0xff] }
  0x2a   :  { %641 = vmatpush.bf16.msra.mxu1 %v1260_v21  ;;  %v1307_v3 = vld [vmem:[#allocation5 + $0x1c8] sm:$0xff]  ;;  %v1290_v5 = vld [vmem:[#allocation5 + $0x140] sm:$0xff]  ;;  %v98_v11 = vld [vmem:[#allocation2 + $0x38] sm:$0xff]  ;;  %v105_v14 = vpack.c.bf16 %v97_v10, %v97_v10 }
  0x2b   :  { %654 = vmatpush.bf16.msra.mxu2 %v1268_v22  ;;  %v1298_v6 = vld [vmem:[#allocation5 + $0x180] sm:$0xff]  ;;  %v96_v8 = vld [vmem:[#allocation2 + $0x28] sm:$0xff]  ;;  %v106_v15 = vpack.c.bf16 %v98_v11, %v98_v11  ;;  %v1321_v16 = vld [vmem:[#allocation7 + $0x38] sm:$0xff] }
  0x2c   :  { %667 = vmatpush.bf16.msra.mxu3 %v1276_v23  ;;  %v95_v7 = vld [vmem:[#allocation2 + $0x20] sm:$0xff]  ;;  %v104_v13 = vpack.c.bf16 %v96_v8, %v96_v8  ;;  %v1320_v17 = vld [vmem:[#allocation7 + $0x30] sm:$0xff]  ;;  %v1319_v18 = vld [vmem:[#allocation7 + $0x28] sm:$0xff] }
  0x2d   :  { %629 = vmatpush.bf16.msra.mxu0 %v1251_v24  ;;  %v1306_v9 = vld [vmem:[#allocation5 + $0x1c0] sm:$0xff]  ;;  %v103_v12 = vpack.c.bf16 %v95_v7, %v95_v7  ;;  %v1317_v20 = vld [vmem:[#allocation7 + $0x18] sm:$0xff]  ;;  %v1316_v22 = vld [vmem:[#allocation7 + $0x10] sm:$0xff] }
  0x2e   :  { %642 = vmatpush.bf16.msra.mxu1 %v1259_v25  ;;  %v1318_v19 = vld [vmem:[#allocation7 + $0x20] sm:$0xff]  ;;  %v1315_v24 = vld [vmem:[#allocation7 + $0x8] sm:$0xff]  ;;  %v1328_v34 = vld [vmem:[#allocation8 + $0x30] sm:$0xff] }
  0x2f   :  { %655 = vmatpush.bf16.msra.mxu2 %v1267_v26  ;;  %v1327_v36 = vld [vmem:[#allocation8 + $0x28] sm:$0xff] }
  0x30   :  { %668 = vmatpush.bf16.msra.mxu3 %v1275_v27 }
  0x31   :  { %630 = vmatpush.bf16.msra.mxu0 %v1250_v28  ;;  %v1314_v28 = vld [vmem:[#allocation7] sm:$0xff] }
  0x32   :  { %643 = vmatpush.bf16.msra.mxu1 %v1258_v29 }
  0x33   :  { %656 = vmatpush.bf16.msra.mxu2 %v1266_v30  ;;  %v1338_v30 = vld [vmem:[%s1577_s2] ss:$0 sm:$0xff] }
  0x34   :  { %669 = vmatpush.bf16.msra.mxu3 %v1274_v31  ;;  %631 = vmatmul.bf16.vlgmr.msra.gmra.mxu0 %v99_v41  ;;  %v1329_v31 = vld [vmem:[#allocation8 + $0x38] sm:$0xff] }
  0x35   :  { %675 = vmatpush.bf16.msrb.mxu0 %v1289_v32  ;;  %644 = vmatmul.bf16.vlgmr.msra.gmra.mxu1 %v100_v43 }
  0x36   :  { %688 = vmatpush.bf16.msrb.mxu1 %v1297_v35  ;;  %657 = vmatmul.bf16.vlgmr.msra.gmra.mxu2 %v101_v40  ;;  %v1325_v40 = vld [vmem:[#allocation8 + $0x18] sm:$0xff] }
  0x37   :  { %701 = vmatpush.bf16.msrb.mxu2 %v1305_v38  ;;  %670 = vmatmul.bf16.vlgmr.msra.gmra.mxu3 %v102_v42  ;;  %v1326_v38 = vld [vmem:[#allocation8 + $0x20] sm:$0xff] }
  0x38   :  { %714 = vmatpush.bf16.msrb.mxu3 %v1313_v39 }
  0x39   :  { %676 = vmatpush.bf16.msrb.mxu0 %v1288_v44 }
  0x3a   :  { %689 = vmatpush.bf16.msrb.mxu1 %v1296_v45  ;;  %v1324_v45 = vld [vmem:[#allocation8 + $0x10] sm:$0xff] }
  0x3b   :  { %702 = vmatpush.bf16.msrb.mxu2 %v1304_v46 }
  0x3c   :  { %715 = vmatpush.bf16.msrb.mxu3 %v1312_v47 }
  0x3d   :  { %677 = vmatpush.bf16.msrb.mxu0 %v1287_v48 }
  0x3e   :  { %690 = vmatpush.bf16.msrb.mxu1 %v1295_v49 }
  0x3f   :  { %703 = vmatpush.bf16.msrb.mxu2 %v1303_v50 }
  0x40   :  { %716 = vmatpush.bf16.msrb.mxu3 %v1311_v51 }
  0x41   :  { %678 = vmatpush.bf16.msrb.mxu0 %v1286_v52 }
  0x42   :  { %691 = vmatpush.bf16.msrb.mxu1 %v1294_v53 }
  0x43   :  { %704 = vmatpush.bf16.msrb.mxu2 %v1302_v54 }
  0x44   :  { %717 = vmatpush.bf16.msrb.mxu3 %v1310_v55 }
  0x45   :  { %679 = vmatpush.bf16.msrb.mxu0 %v1285_v56 }
  0x46   :  { %692 = vmatpush.bf16.msrb.mxu1 %v1293_v57  ;;  %v1323_v57 = vld [vmem:[#allocation8 + $0x8] sm:$0xff] }
  0x47   :  { %705 = vmatpush.bf16.msrb.mxu2 %v1301_v58  ;;  %v1322_v58 = vld [vmem:[#allocation8] sm:$0xff] }
  0x48   :  { %718 = vmatpush.bf16.msrb.mxu3 %v1309_v59  ;;  %v1339_v59 = vld [vmem:[%s1579_s4] ss:$0 sm:$0xff]  ;;  %s1502_s4 = smov [#allocation11]  }
  0x49   :  { %680 = vmatpush.bf16.msrb.mxu0 %v1284_v60  ;;  %s911_s11 = sshll.u32 %s1502_s4, 4  ;;  %s912_s11 = int_to_ptr.vmem [resolvable:$true] %s911_s11 }
  0x4a   :  { %693 = vmatpush.bf16.msrb.mxu1 %v1292_v61 }
  0x4b   :  { %706 = vmatpush.bf16.msrb.mxu2 %v1300_v62 }
  0x4c   :  { %719 = vmatpush.bf16.msrb.mxu3 %v1308_v63 }
  0x4d   :  { %681 = vmatpush.bf16.msrb.mxu0 %v1283_v0 }
  0x4e   :  { %694 = vmatpush.bf16.msrb.mxu1 %v1291_v1  ;;  %v1340_v1 = vld [vmem:[%s1581_s6] ss:$0 sm:$0xff] }
  0x4f   :  { %707 = vmatpush.bf16.msrb.mxu2 %v1299_v2 }
  0x50   :  { %720 = vmatpush.bf16.msrb.mxu3 %v1307_v3 }
  0x51   :  { %682 = vmatpush.bf16.msrb.mxu0 %v1282_v4 }
  0x52   :  { %695 = vmatpush.bf16.msrb.mxu1 %v1290_v5 }
  0x53   :  { %708 = vmatpush.bf16.msrb.mxu2 %v1298_v6 }
  0x54   :  { %721 = vmatpush.bf16.msrb.mxu3 %v1306_v9  ;;  %683 = vmatmul.bf16.vlgmr.msrb.gmra.mxu0 %v103_v12 }
  0x55   :  { %696 = vmatmul.bf16.vlgmr.msrb.gmra.mxu1 %v104_v13  ;;  %798 = vmatpush.bf16.msra.mxu0 %v1321_v16 }
  0x56   :  { %709 = vmatmul.bf16.vlgmr.msrb.gmra.mxu2 %v105_v14  ;;  %881 = vmatpush.bf16.msra.mxu1 %v1329_v31 }
  0x57   :  { %722 = vmatmul.bf16.vlgmr.msrb.gmra.mxu3 %v106_v15 }
  0x59   :  { %799 = vmatpush.bf16.msra.mxu0 %v1320_v17 }
  0x5a   :  { %882 = vmatpush.bf16.msra.mxu1 %v1328_v34 }
  0x5d   :  { %800 = vmatpush.bf16.msra.mxu0 %v1319_v18 }
  0x5e   :  { %883 = vmatpush.bf16.msra.mxu1 %v1327_v36 }
  0x61   :  { %801 = vmatpush.bf16.msra.mxu0 %v1318_v19 }
  0x62   :  { %884 = vmatpush.bf16.msra.mxu1 %v1326_v38 }
  0x65   :  { %802 = vmatpush.bf16.msra.mxu0 %v1317_v20 }
  0x66   :  { %885 = vmatpush.bf16.msra.mxu1 %v1325_v40 }
  0x69   :  { %803 = vmatpush.bf16.msra.mxu0 %v1316_v22 }
  0x6a   :  { %886 = vmatpush.bf16.msra.mxu1 %v1324_v45 }
  0x6d   :  { %804 = vmatpush.bf16.msra.mxu0 %v1315_v24 }
  0x6e   :  { %887 = vmatpush.bf16.msra.mxu1 %v1323_v57 }
  0x71   :  { %805 = vmatpush.bf16.msra.mxu0 %v1314_v28 }
  0x72   :  { %888 = vmatpush.bf16.msra.mxu1 %v1322_v58 }
  0xb1   :  { %v632_v21 = vpop.f32.mrf.mxu0 }
  0xb2   :  { %v645_v23 = vpop.f32.mrf.mxu1  ;;  %v633_v35 = vadd.f32 %v1338_v30, %v632_v21 }
  0xb4   :  { %v646_v37 = vadd.f32 %v645_v23, %v633_v35 }
  0xb9   :  { %v658_v25 = vpop.f32.mrf.mxu2  ;;  %v634_v27 = vpop.f32.mrf.mxu0 }
  0xba   :  { %v671_v26 = vpop.f32.mrf.mxu3  ;;  %v647_v29 = vpop.f32.mrf.mxu1  ;;  %v659_v39 = vadd.f32 %v658_v25, %v646_v37 }
  0xbc   :  { %v672_v41 = vadd.f32 %v671_v26, %v659_v39 }
  0xc1   :  { %v660_v32 = vpop.f32.mrf.mxu2 }
  0xc2   :  { %v673_v33 = vpop.f32.mrf.mxu3 }
  0xd1   :  { %v684_v42 = vpop.f32.mrf.mxu0 }
  0xd2   :  { %v697_v43 = vpop.f32.mrf.mxu1  ;;  %v685_v44 = vadd.f32 %v684_v42, %v672_v41 }
  0xd4   :  { %v698_v46 = vadd.f32 %v697_v43, %v685_v44 }
  0xd9   :  { %v710_v47 = vpop.f32.mrf.mxu2  ;;  %v686_v50 = vpop.f32.mrf.mxu0 }
  0xda   :  { %v723_v48 = vpop.f32.mrf.mxu3  ;;  %v711_v49 = vadd.f32 %v710_v47, %v698_v46  ;;  %v699_v51 = vpop.f32.mrf.mxu1 }
  0xdc   :  { %v724_v52 = vadd.f32 %v723_v48, %v711_v49 }
  0xde   :  { %v727_v53 = vmax.f32 %v724_v52, 0.0 }
  0xe0   :  { %728 = vst [vmem:[#allocation10] sm:$0xff] %v727_v53  ;;  %v729_v54 = vpack.c.bf16 %v727_v53, %v727_v53 }
  0xe1   :  { %v712_v55 = vpop.f32.mrf.mxu2  ;;  %905 = dma.vmem_to_hbm [thread:$0]  %s901_s27, 128, %s903_s30, [#allocation4]  }
  0xe2   :  { %v725_v56 = vpop.f32.mrf.mxu3  ;;  %806 = vmatmul.bf16.vlgmr.msra.gmra.mxu0 %v729_v54 }
 0x15f   :  { %v807_v60 = vpop.f32.mrf.mxu0 }
 0x160   :  { %v808_v61 = vadd.f32 %v1339_v59, %v807_v60 }
 0x162   :  { %v811_v62 = vmax.f32 %v808_v61, 0.0 }
 0x164   :  { %v812_v63 = vpack.c.bf16 %v811_v62, %v811_v62 }
 0x166   :  { %889 = vmatmul.bf16.vlgmr.msra.gmra.mxu1 %v812_v63 }
 0x167   :  { %v809_v0 = vpop.f32.mrf.mxu0 }
 0x1e3   :  { %v890_v2 = vpop.f32.mrf.mxu1 }
 0x1e4   :  { %v891_v3 = vadd.f32 %v1340_v1, %v890_v2 }
 0x1e6   :  { %894 = vst [vmem:[#allocation11] sm:$0xff] %v891_v3 }
 0x1e7   :  { %916 = dma.vmem_to_hbm [thread:$0]  %s912_s11, 128, %s914_s14, [#allocation12]  }
 0x1eb   :  { %v892_v4 = vpop.f32.mrf.mxu1 }
 0x1ec   :  { %1491 = dma.done.wait [#allocation4], 128  }
 0x1ed   :  { %1492 = vsyncadd [#allocation4], 4294967168 }
 0x1ee   :  { %1493 = dma.done.wait [#allocation12], 128  }
 0x1ef   :  { %1494 = vsyncadd [#allocation12], 4294967168 }
 0x1f0   :  { %925 = vsyncpa [#allocation3], 1 }
 0x1f1   :  { %926 = vsyncpa [#allocation6], 1 }
 0x1f2   :  { %927 = vsyncpa [#allocation9], 1 }
 0x1f3   :  { %928 = vsyncpa [#allocation4], 1 }
 0x1f4   :  { %929 = vsyncpa [#allocation12], 1 }

</bundles_post_ra>
